<compile_context>
chip_gen: v7x
topology: tpu7x:2x2x1
jax: 0.10.0
libtpu: 0.0.40
codegen_flags: <defaults>
</compile_context>

<pallas_src>
import functools

import jax
import jax.numpy as jnp
from jax.experimental import pallas as pl
from jax.experimental.pallas import tpu as pltpu


def _layernorm_kernel(alpha_ref, gamma_ref, x_ref, o_ref, *, eps, d_model):
    # alpha_ref / gamma_ref: SMEM f32[1] scalars (PyTorch scalar Parameters).
    # x_ref / o_ref:         [TM, d_model] VMEM tiles (rows=tokens, features on lanes).
    x = x_ref[...].astype(jnp.float32)
    mean = jnp.mean(x, axis=-1, keepdims=True)
    centered = x - mean
    # torch.Tensor.std defaults to the unbiased estimator (divide by N-1).
    var = jnp.sum(centered * centered, axis=-1, keepdims=True) / (d_model - 1)
    std = jnp.sqrt(var)
    alpha = alpha_ref[0]
    gamma = gamma_ref[0]
    o_ref[...] = (alpha * centered / (std + eps) + gamma).astype(o_ref.dtype)


def layer_norm(x, alpha, gamma, *, eps=1e-6, tm=512):
    """Pallas LayerNorm over the last dim of x: [B, S, d_model] -> [B, S, d_model]."""
    B, S, d_model = x.shape
    T = B * S
    x2d = x.reshape(T, d_model)

    # Token-dimension tiling: rows must be a multiple of 8 (f32 sublane tiling).
    tm = min(tm, pl.cdiv(T, 8) * 8)
    tm = max(8, (tm // 8) * 8)
    T_pad = pl.cdiv(T, tm) * tm
    if T_pad != T:
        # Padded rows normalize to `gamma` (std=0 -> eps denominator); sliced off below.
        x2d = jnp.pad(x2d, ((0, T_pad - T), (0, 0)))

    alpha = jnp.asarray(alpha, jnp.float32).reshape(1)
    gamma = jnp.asarray(gamma, jnp.float32).reshape(1)

    kernel = functools.partial(_layernorm_kernel, eps=float(eps), d_model=d_model)

    out2d = pl.pallas_call(
        kernel,
        out_shape=jax.ShapeDtypeStruct((T_pad, d_model), x.dtype),
        grid_spec=pltpu.PrefetchScalarGridSpec(
            num_scalar_prefetch=0,
            grid=(T_pad // tm,),
            in_specs=[
                pl.BlockSpec(memory_space=pltpu.MemorySpace.SMEM),   # alpha (resident)
                pl.BlockSpec(memory_space=pltpu.MemorySpace.SMEM),   # gamma (resident)
                pl.BlockSpec((tm, d_model), lambda i: (i, 0)),       # x tile
            ],
            out_specs=pl.BlockSpec((tm, d_model), lambda i: (i, 0)),
        ),
        compiler_params=pltpu.CompilerParams(
            dimension_semantics=("parallel",),   # shard token tiles across TCs (v7x)
            vmem_limit_bytes=48 << 20,           # explicit cap, safe on 64 MiB v7x VMEM
        ),
    )(alpha, gamma, x2d)

    if T_pad != T:
        out2d = out2d[:T]
    return out2d.reshape(B, S, d_model)


def decoder_forward(x, encoder_output, src_mask, target_mask, layers,
                    alpha, gamma, *, eps=1e-6, tm=512):
    """Decoder.forward: apply each (opaque) layer, then the Pallas LayerNorm."""
    for layer in layers:
        x = layer(x, encoder_output, src_mask, target_mask)
    return layer_norm(x, alpha, gamma, eps=eps, tm=tm)


if __name__ == "__main__":
    # Small shapes consistent with the module's forward: [batch, seq, d_model].
    B, S, d_model = 2, 8, 32
    eps = 1e-6

    key = jax.random.PRNGKey(0)
    kx, ke = jax.random.split(key, 2)
    x = jax.random.normal(kx, (B, S, d_model), dtype=jnp.float32)
    encoder_output = jax.random.normal(ke, (B, S, d_model), dtype=jnp.float32)
    src_mask = jnp.ones((B, 1, 1, S), dtype=jnp.float32)
    target_mask = jnp.tril(jnp.ones((S, S), dtype=jnp.float32))[None, None, :, :]

    # Placeholder identity layers: the DecoderBlock class is not defined in the
    # spec (layers are injected as an nn.ModuleList).
    layers = [lambda h, enc, sm, tmk: h for _ in range(2)]

    alpha = jnp.ones((1,), jnp.float32)    # nn.Parameter(torch.ones(1))
    gamma = jnp.zeros((1,), jnp.float32)   # nn.Parameter(torch.zeros(1))

    # tm=8 so the toy run exercises a multi-step grid (grid=(2,)).
    out = decoder_forward(x, encoder_output, src_mask, target_mask, layers,
                          alpha, gamma, eps=eps, tm=8)
    jax.block_until_ready(out)

    # Pure-JAX reference of Decoder.forward with the same placeholder layers.
    ref = x
    for layer in layers:
        ref = layer(ref, encoder_output, src_mask, target_mask)
    mean = ref.mean(axis=-1, keepdims=True)
    std = jnp.sqrt(((ref - mean) ** 2).sum(axis=-1, keepdims=True) / (d_model - 1))
    ref = alpha[0] * (ref - mean) / (std + eps) + gamma[0]

    assert jnp.allclose(out, ref, atol=1e-5, rtol=1e-5), "mismatch vs reference"
    print("KERNEL_OK")
</pallas_src>

<mosaic_0001>
module attributes {stable_mosaic.version = 11 : i64} {
  func.func @_layernorm_kernel(%arg0: i32, %arg1: memref<1xf32, #tpu.memory_space<smem>>, %arg2: memref<1xf32, #tpu.memory_space<smem>>, %arg3: memref<8x32xf32, #tpu.memory_space<vmem>>, %arg4: memref<8x32xf32, #tpu.memory_space<vmem>>) attributes {dimension_semantics = [#tpu.dimension_semantics<parallel>], iteration_bounds = array<i64: 2>, scalar_prefetch = 0 : i64, scratch_operands = 0 : i64, tpu.core_type = #tpu.core_type<tc>, window_params = [{transform_indices = @transform_0, window_bounds = array<i64: 1>}, {transform_indices = @transform_1, window_bounds = array<i64: 1>}, {transform_indices = @transform_2, window_bounds = array<i64: 8, 32>}, {transform_indices = @transform_3, window_bounds = array<i64: 8, 32>}]} {
    %c0 = arith.constant 0 : index
    %c0_0 = arith.constant 0 : index
    %0 = vector.load %arg3[%c0, %c0_0] : memref<8x32xf32, #tpu.memory_space<vmem>>, vector<8x32xf32>
    %cst = arith.constant dense<0.000000e+00> : vector<8xf32>
    %1 = vector.multi_reduction <add>, %0, %cst [1] : vector<8x32xf32> to vector<8xf32>
    %2 = vector.shape_cast %1 : vector<8xf32> to vector<8x1xf32>
    %cst_1 = arith.constant 3.200000e+01 : f32
    %3 = vector.broadcast %cst_1 : f32 to vector<8x1xf32>
    %4 = arith.divf %2, %3 : vector<8x1xf32>
    %5 = vector.broadcast %4 : vector<8x1xf32> to vector<8x32xf32>
    %6 = arith.subf %0, %5 : vector<8x32xf32>
    %7 = arith.mulf %6, %6 : vector<8x32xf32>
    %cst_2 = arith.constant dense<0.000000e+00> : vector<8xf32>
    %8 = vector.multi_reduction <add>, %7, %cst_2 [1] : vector<8x32xf32> to vector<8xf32>
    %9 = vector.shape_cast %8 : vector<8xf32> to vector<8x1xf32>
    %cst_3 = arith.constant 3.100000e+01 : f32
    %10 = vector.broadcast %cst_3 : f32 to vector<8x1xf32>
    %11 = arith.divf %9, %10 : vector<8x1xf32>
    %12 = math.sqrt %11 : vector<8x1xf32>
    %c0_4 = arith.constant 0 : index
    %13 = memref.load %arg1[%c0_4] : memref<1xf32, #tpu.memory_space<smem>>
    %c0_5 = arith.constant 0 : index
    %14 = memref.load %arg2[%c0_5] : memref<1xf32, #tpu.memory_space<smem>>
    %15 = vector.broadcast %13 : f32 to vector<8x32xf32>
    %16 = arith.mulf %15, %6 : vector<8x32xf32>
    %cst_6 = arith.constant 9.99999997E-7 : f32
    %17 = vector.broadcast %cst_6 : f32 to vector<8x1xf32>
    %18 = arith.addf %12, %17 : vector<8x1xf32>
    %19 = vector.broadcast %18 : vector<8x1xf32> to vector<8x32xf32>
    %20 = arith.divf %16, %19 : vector<8x32xf32>
    %21 = vector.broadcast %14 : f32 to vector<8x32xf32>
    %22 = arith.addf %20, %21 : vector<8x32xf32>
    %c0_7 = arith.constant 0 : index
    %c0_8 = arith.constant 0 : index
    %23 = vector.load %arg4[%c0_7, %c0_8] : memref<8x32xf32, #tpu.memory_space<vmem>>, vector<8x32xf32>
    tpu.vector_store %arg4[%c0_7, %c0_8], %22 {strides = array<i32>} : memref<8x32xf32, #tpu.memory_space<vmem>>, vector<8x32xf32>,
    return
  }
  func.func @transform_0(%arg0: i32) -> i32 {
    %c0_i32 = arith.constant 0 : i32
    %c0_i32_0 = arith.constant 0 : i32
    return %c0_i32 : i32
  }
  func.func @transform_1(%arg0: i32) -> i32 {
    %c0_i32 = arith.constant 0 : i32
    %c0_i32_0 = arith.constant 0 : i32
    return %c0_i32 : i32
  }
  func.func @transform_2(%arg0: i32) -> (i32, i32) {
    %c0_i32 = arith.constant 0 : i32
    %c0_i32_0 = arith.constant 0 : i32
    return %arg0, %c0_i32 : i32, i32
  }
  func.func @transform_3(%arg0: i32) -> (i32, i32) {
    %c0_i32 = arith.constant 0 : i32
    %c0_i32_0 = arith.constant 0 : i32
    return %arg0, %c0_i32 : i32, i32
  }
}

</mosaic_0001>

<bundles_post_ra>
// kernel: tpu_custom_call.1
= control target key start
LH: loop header
LB: loop body
LE: loop exit
PB: predicated region body
PF: predicated region fallthrough
CT: control target
= control target key end

     0   :  { %s659_s0 = inlined_call_operand.<no memory space> [shape: f32[1], index: 0, kind: input, shape index: {}]   ;;  %s660_s1 = inlined_call_operand.<no memory space> [shape: f32[1], index: 1, kind: input, shape index: {}]   ;;  %s661_s2 = inlined_call_operand.hbm [shape: f32[16,32], index: 2, kind: input, shape index: {}]   ;;  %s662_s3 = inlined_call_operand.hbm [shape: f32[16,32], index: 3, kind: output, shape index: {}]  }
   0x1   :  { %8 = sst [smem:[#allocation2]] %s659_s0 }
   0x2   :  { %9 = sst [smem:[#allocation3]] %s660_s1 }
   0x3   :  { %10 = vsyncpa [#allocation5], 0 }
   0x4   :  { %12 = vsyncpa [#allocation5 + $0x1], 0 }
   0x5   :  { %13 = vsyncpa [#allocation6], 0 }
   0x6   :  { %15 = vsyncpa [#allocation6 + $0x1], 0  ;;  %s491_s16 = smov 0   ;;  %s493_s17 = smov 0  }
   0x7   :  { %s495_s18 = smov 0   ;;  %s497_s19 = smov 0  }
   0x8 LB: > { %s512_s0 = sadd.s32 4294967295, %s461_s19   ;;  %s303_s1 = sadd.s32 4294967294, %s461_s19   ;;  %s461_s19 = sphi %s497_s19, %s677_s19   ;;  %s457_s18 = sphi %s495_s18, %s676_s18   ;;  %s453_s17 = sphi %s493_s17, %s675_s17   ;;  %s449_s16 = sphi %s491_s16, %s674_s16  }
   0x9   : > { %s516_s20 = sadd.s32 1, %s461_s19   ;;  %s70_s21 = sadd.s32 1, %s457_s18 }
   0xa   : > { %s67_s22 = ssub.s32 %s461_s19, %s516_s20  ;;  %p77_p0 = scmp.ne.s32.totalorder %s457_s18, %s453_s17 }
   0xb   : > { %p68_p1 = scmp.eq.s32.totalorder %s67_s22, 0  ;;  %p78_p2 = scmp.eq.s32.totalorder %s461_s19, 0 }
   0xc   : > { %p83_p3 = scmp.ne.s32.totalorder %s453_s17, %s449_s16  ;;  %p84_p4 = scmp.eq.s32.totalorder %s512_s0, 0 }
   0xd   : > { %s528_s23 = scalar_select %p68_p1, %s457_s18, %s70_s21  }
   0xe   : > { %p530_p5 = por %p78_p2, %p77_p0  ;;  %p534_p6 = por %p84_p4, %p83_p3 }
   0xf   : > { %p107_p7 = scmp.eq.s32.totalorder %s512_s0, 1  ;;  %p113_p8 = scmp.eq.s32.totalorder %s303_s1, 1 }
  0x10   : > { %p327_p10 = scmp.lt.s32.totalorder %s461_s19, 2  ;;  %s139_s28 = sand.u32 1, %s457_s18  }
  0x11   : > { %p541_p11 = por %p107_p7, %p77_p0  ;;  %p545_p12 = por %p113_p8, %p83_p3 }
  0x12   : > { %s307_s29 = sshll.u32 %s461_s19, 7  ;;  %s306_s30 = sshll.u32 %s139_s28, 3 }
  0x13   : > { %s666_s26 = scalar_select %p541_p11, 1, 0 }
  0x14   : > { %s667_s27 = scalar_select %p545_p12, 1, 0 }
  0x15   : > { %s554_s6 = scalar_lea.hbm %s661_s2, %s307_s29  ;;  %s143_s7 = scalar_lea.vmem [#allocation4], %s306_s30 }
  0x16   : > { %s150_s8 = sshll.u32 %s143_s7, 4  ;;  %p558_p13 = pnand %p327_p10, %p530_p5  ;;  %s562_s8 = int_to_ptr.vmem [resolvable:$true] %s150_s8 }
  0x17   : > { %s140_s10 = scalar_lea.sflag [#allocation5], %s139_s28  ;;  %s365_s11 = scalar_lea.hbm %s554_s6, 128 }
  0x18   : > { %p366_p2 = scmp.ne.s32.totalorder %s554_s6, %s365_s11  ;;  %p367_p3 = pneg %p558_p13 }
  0x19   : > { %s370_s14 = scalar_lea.hbm %s661_s2, 256  ;;  %p371_p5 = scmp.lt.u32.totalorder %s554_s6, %s661_s2 }
  0x1a   : > { %p368_p4 = pnand %p367_p3, %p366_p2  ;;  %p372_p8 = scmp.lt.u32.totalorder %s370_s14, %s365_s11 }
  0x1b   : > { %p374_p9 = scmp.lt.u32.totalorder %s365_s11, %s554_s6 }
  0x1c   : > { %p369_p7 = pneg %p368_p4  ;;  %p373_p10 = por %p372_p8, %p371_p5 }
  0x1e   : > { %p375_p0 = por %p374_p9, %p373_p10 }
  0x20   : > { %p376_p1 = pnand %p375_p0, %p369_p7 }
  0x22   : > { %379 = shalt.err (!%p376_p1)
}
  0x23   : > { %s380_s21 = scalar_lea.vmem %s562_s8, 128  ;;  %s463_s22 = smov [#allocation4]  }
  0x24   : > { %p381_p2 = scmp.ne.s32.totalorder %s562_s8, %s380_s21  ;;  %s385_s24 = sshll.u32 %s463_s22, 4  ;;  %s386_s24 = int_to_ptr.vmem [resolvable:$false] %s385_s24 }
  0x25   : > { %s387_s28 = scalar_lea.vmem %s386_s24, 256  ;;  %p388_p11 = scmp.lt.s32.totalorder %s562_s8, %s386_s24 }
  0x26   : > { %p383_p4 = pnand %p381_p2, %p367_p3  ;;  %p389_p5 = scmp.lt.s32.totalorder %s387_s28, %s380_s21 }
  0x28   : > { %p384_p12 = pneg %p383_p4  ;;  %p390_p8 = por %p389_p5, %p388_p11 }
  0x2a   : > { %p391_p9 = pnand %p390_p8, %p384_p12 }
  0x2c   : > { %394 = shalt.err (!%p391_p9)
}
  0x2d   : > { %322 = dma.hbm_to_vmem [thread:$0]  (!%p558_p13), %s554_s6, 128, %s562_s8, %s140_s10  }
  0x2e   : > { %p669_p0 = scmp.lt.s32.totalorder %s461_s19, 3  ;;  %p670_p1 = scmp.ge.s32.totalorder %s461_s19, 1 }
  0x30   : > { %p156_p3 = pnand %p670_p1, %p669_p0 }
  0x31   : > { %s596_s29 = sand.u32 (!%p156_p3), 1, %s453_s17  }
  0x32   : > { %159 = sbr.rel (%p156_p3) target bundleno = 399 (0x18f), region = 32  ;;  %s309_s30 = sshll.u32 (!%p156_p3), %s596_s29, 3 }
  0x33   : > { %s162_s4 = scalar_lea.sflag (!%p156_p3), [#allocation5], %s596_s29  ;;  %s165_s5 = scalar_lea.vmem (!%p156_p3), [#allocation4], %s309_s30 }
  0x39   : > { %440 = dma.done.wait (%p534_p6), %s162_s4, 128  }
  0x3a   : > { %442 = vsyncadd (%p534_p6), %s162_s4, 4294967168  ;;  %vm189_vm0 = vcmask 261120   ;;  %v188_v0 = vld [vmem:[%s165_s5] sm:$0xff]  ;;  %s209_s25 = sld [smem:[#allocation2]]  ;;  %s312_s7 = sshll.u32 %s512_s0, 7 }
  0x3b   : > { %v190_v1 = vsel %vm189_vm0, %v188_v0, 0.0  ;;  %s210_s6 = sld [smem:[#allocation3]]  ;;  %s187_s8 = scalar_lea.vmem [#allocation7], %s309_s30 }
  0x3c   : > { %191 = vadd.xlane.f32.xlu0 %v190_v1  ;;  %s233_s9 = sshll.u32 %s187_s8, 4  ;;  %s614_s12 = scalar_lea.hbm %s662_s3, %s312_s7  ;;  %s616_s9 = int_to_ptr.vmem [resolvable:$true] %s233_s9 }
  0x3d   : > { %s220_s13 = scalar_lea.sflag [#allocation6], %s596_s29  ;;  %s395_s14 = scalar_lea.vmem %s616_s9, 128 }
  0x3e   : > { %p396_p6 = scmp.ne.s32.totalorder %s616_s9, %s395_s14  ;;  %p671_p11 = scmp.ne.s32.totalorder %s666_s26, 0 }
  0x3f   : > { %s464_s0 = smov [#allocation7]  }
  0x40   : > { %v211_v15 = vstv %s209_s25  ;;  %p397_p12 = pnand %p396_p6, %p671_p11  ;;  %s399_s15 = sshll.u32 %s464_s0, 4  ;;  %s400_s15 = int_to_ptr.vmem [resolvable:$false] %s399_s15 }
  0x41   : > { %v216_v18 = vstv %s210_s6  ;;  %s401_s1 = scalar_lea.vmem %s400_s15, 256  ;;  %p402_p7 = scmp.lt.s32.totalorder %s616_s9, %s400_s15 }
  0x42   : > { %p398_p13 = pneg %p397_p12  ;;  %p403_p10 = scmp.lt.s32.totalorder %s401_s1, %s395_s14 }
  0x44   : > { %p404_p2 = por %p403_p10, %p402_p7 }
  0x46   : > { %p405_p4 = pnand %p404_p2, %p398_p13 }
  0xc9   : > { %v192_v2 = vpop.xlane.xlu0 %191 }
  0xca   : > { %v194_v3 = vmul.f32 0.03125, %v192_v2 }
  0xcc   : > { %v195_v4 = vsub.f32 %v188_v0, %v194_v3 }
  0xce   : > { %v196_v5 = vmul.f32 %v195_v4, %v195_v4  ;;  %v212_v16 = vmul.f32 %v211_v15, %v195_v4 }
  0xd0   : > { %v197_v6 = vsel %vm189_vm0, %v196_v5, 0.0 }
  0xd1   : > { %198 = vadd.xlane.f32.xlu0 %v197_v6 }
 0x15e   : > { %v199_v7 = vpop.xlane.xlu0 %198 }
 0x15f   : > { %v201_v8 = vmul.f32 0.032258064, %v199_v7 }
 0x161   : > { %361 = vrsqrt.f32 %v201_v8  ;;  %vm204_vm1 = vcmp.eq.f32.partialorder %v201_v8, inf  ;;  %v207_v11 = vand.u32 2147483648, %v201_v8  ;;  %vm206_vm2 = vcmp.eq.f32.partialorder %v201_v8, 0.0 }
 0x16b   : > { %v362_v9 = vpop.eup %361 }
 0x16c   : > { %v203_v10 = vmul.f32 %v362_v9, %v201_v8 }
 0x16e   : > { %v205_v12 = vsel %vm204_vm1, %v201_v8, %v203_v10 }
 0x16f   : > { %v208_v13 = vsel %vm206_vm2, %v207_v11, %v205_v12 }
 0x170   : > { %v213_v14 = vadd.f32 1e-06, %v208_v13 }
 0x172   : > { %363 = vrcp.f32 %v213_v14 }
 0x17c   : > { %v364_v17 = vpop.eup %363 }
 0x17d   : > { %v215_v19 = vmul.f32 %v364_v17, %v212_v16 }
 0x17f   : > { %v217_v20 = vadd.f32 %v216_v18, %v215_v19 }
 0x181   : > { %218 = vst.msk [vmem:[%s187_s8] sm:$0xff] %vm189_vm0, %v217_v20 }
 0x182   : > { %408 = shalt.err (!%p405_p4)
}
 0x183   : > { %s409_s21 = scalar_lea.hbm %s614_s12, 128  ;;  %s413_s28 = scalar_lea.hbm %s662_s3, 256 }
 0x184   : > { %p410_p5 = scmp.ne.s32.totalorder %s614_s12, %s409_s21  ;;  %p414_p0 = scmp.lt.u32.totalorder %s614_s12, %s662_s3 }
 0x185   : > { %p415_p1 = scmp.lt.u32.totalorder %s413_s28, %s409_s21  ;;  %p417_p6 = scmp.lt.u32.totalorder %s409_s21, %s614_s12 }
 0x186   : > { %p411_p8 = pnand %p410_p5, %p671_p11 }
 0x187   : > { %p416_p3 = por %p415_p1, %p414_p0 }
 0x188   : > { %p412_p9 = pneg %p411_p8 }
 0x189   : > { %p418_p12 = por %p417_p6, %p416_p3 }
 0x18b   : > { %p419_p13 = pnand %p418_p12, %p412_p9 }
 0x18d   : > { %422 = shalt.err (!%p419_p13)
}
 0x18e   : > { %317 = dma.vmem_to_hbm [thread:$0]  (%p671_p11), %s616_s9, 128, %s614_s12, %s220_s13  }
 0x18f PF: > { %s245_s4 = sand.u32 1, %s449_s16   ;;  %p672_p7 = scmp.ne.s32.totalorder %s667_s27, 0 }
 0x190   : > { %p673_p10 = scmp.ge.s32.totalorder %s461_s19, 2  ;;  %s246_s5 = scalar_lea.sflag [#allocation6], %s245_s4 }
 0x192   : > { %p324_p2 = pnand %p673_p10, %p672_p7 }
 0x194   : > { %444 = dma.done.wait (!%p324_p2), %s246_s5, 128  }
 0x195   : > { %446 = vsyncadd (!%p324_p2), %s246_s5, 4294967168  ;;  %p18_p4 = scmp.ge.s32.totalorder %s516_s20, 4   ;;  %s674_s16 = smov %s453_s17 }
 0x196   : > { %s675_s17 = smov %s457_s18  ;;  %s676_s18 = smov %s528_s23 }
 0x197   : > { %s677_s19 = smov %s516_s20  ;;  %20 = sbr.rel (!%p18_p4) target bundleno = 8 (0x8), region = 77 }
 0x19e   :  { %251 = vsyncpa [#allocation5], 1 }
 0x19f   :  { %253 = vsyncpa [#allocation5 + $0x1], 1 }
 0x1a0   :  { %254 = vsyncpa [#allocation6], 1 }
 0x1a1   :  { %256 = vsyncpa [#allocation6 + $0x1], 1 }

</bundles_post_ra>
